<compile_context>
chip_gen: v7x
topology: tpu7x:2x2x1
jax: 0.10.0
libtpu: 0.0.40
codegen_flags: <defaults>
</compile_context>

<pallas_src>
import functools

import jax
import jax.numpy as jnp
from jax.experimental import pallas as pl
from jax.experimental.pallas import tpu as pltpu

_ROW_TILE_MAX = 512     # absolute sublane-axis tile cap
_HW_TILE_MAX = 8192     # absolute lane-axis tile cap


# ---------------------------------------------------------------------------
# Per-generation budgeting & tile selection
# ---------------------------------------------------------------------------
def _hw_budget():
    """VMEM / parallelism budget per TPU generation (trace-time query)."""
    try:
        info = pltpu.get_tpu_info()
        vmem_bytes = int(getattr(info, "vmem_capacity_bytes", 128 * 1024 * 1024))
    except Exception:  # non-TPU trace / interpret: assume big-VMEM parts
        vmem_bytes = 128 * 1024 * 1024
    if vmem_bytes <= 80 * 1024 * 1024:
        # v7x-class: 64 MiB VMEM per TC, 2 TCs -> smaller blocks, need >=8
        # grid blocks so both TensorCores get work.
        return {"block_bytes": 2 * 1024 * 1024,
                "vmem_limit": 48 * 1024 * 1024,
                "min_blocks": 8}
    # v5e / v6e: 128 MiB VMEM, 1 TC -> bigger blocks amortize grid-step
    # overhead (measured ~85% -> ~87% of HBM roofline).  The explicit limit
    # is load-bearing on v5e (16 MiB scoped default).
    return {"block_bytes": 4 * 1024 * 1024,
            "vmem_limit": 64 * 1024 * 1024,
            "min_blocks": 1}


def _pick_hw_tile(HW, cap):
    """Multiple of 128 <= cap that minimizes ragged-tail padding (ties ->
    larger tile).  If HW <= 128, use the full extent (always legal)."""
    if HW <= 128:
        return HW
    cap = min(cap, HW)
    best_t, best_pad = 128, None
    t = 128
    while t <= cap:
        pad = pl.cdiv(HW, t) * t - HW
        if best_pad is None or pad <= best_pad:
            best_t, best_pad = t, pad
        t += 128
    return best_t


def _pick_row_tile(R, align, cap):
    """Multiple of `align` <= cap minimizing tail padding (ties -> larger)."""
    if R <= align:
        return R  # full extent, always legal
    cap = min(cap, R)
    best_t, best_pad = align, None
    t = align
    while t <= cap:
        pad = pl.cdiv(R, t) * t - R
        if best_pad is None or pad <= best_pad:
            best_t, best_pad = t, pad
        t += align
    return best_t


def _ensure_parallelism(R, HW, r_t, hw_t, sub_align, min_blocks):
    """Shrink tiles (rows first, to keep lane-dense stores) until the grid
    has at least `min_blocks` blocks -- feeds both v7x TensorCores."""
    def nblocks(rt, ht):
        return pl.cdiv(R, rt) * pl.cdiv(HW, ht)

    while nblocks(r_t, hw_t) < min_blocks:
        if r_t > sub_align:
            r_t = max(sub_align, (r_t // 2) // sub_align * sub_align)
        elif hw_t > 128:
            hw_t = max(128, (hw_t // 2) // 128 * 128)
        else:
            break
    return r_t, hw_t


def _choose_tiles(R, HW, itemsize, budget):
    # Sublane alignment follows the packed sublane count of the I/O dtype.
    sub_align = max(8, 32 // max(itemsize, 1))
    max_elems = max(budget["block_bytes"] // 4, 128 * sub_align)  # f32 working set
    # Lane tile first (lane-dense stores are the biggest single lever).
    hw_cap = min(_HW_TILE_MAX, max(128, (max_elems // sub_align) // 128 * 128))
    hw_t = _pick_hw_tile(HW, hw_cap)
    # Row tile from the remaining element budget.
    r_cap = min(_ROW_TILE_MAX,
                max(sub_align, (max_elems // hw_t) // sub_align * sub_align))
    r_t = _pick_row_tile(R, sub_align, r_cap)
    return _ensure_parallelism(R, HW, r_t, hw_t, sub_align, budget["min_blocks"])


def _param_rows(param, N, C):
    """(1, C, 1, 1) per-channel param -> per-row (N*C, 1) f32 column."""
    p = param.astype(jnp.float32).reshape(1, C)
    return jnp.broadcast_to(p, (N, C)).reshape(N * C, 1)


# ---------------------------------------------------------------------------
# Kernels (params arrive pre-transformed: softplus(h), tanh(a) hoisted)
# ---------------------------------------------------------------------------
def _bitparm_kernel_nonfinal(x_ref, sph_ref, b_ref, ta_ref, o_ref):
    # x_ref: (Rt, HWt); params: (Rt, 1) f32, broadcast along lanes.
    y = x_ref[...].astype(jnp.float32) * sph_ref[...] + b_ref[...]
    o_ref[...] = (y + jnp.tanh(y) * ta_ref[...]).astype(o_ref.dtype)


def _bitparm_kernel_final(x_ref, sph_ref, b_ref, o_ref):
    y = x_ref[...].astype(jnp.float32) * sph_ref[...] + b_ref[...]
    o_ref[...] = jax.nn.sigmoid(y).astype(o_ref.dtype)


def _bitparm_chain_kernel(x_ref, sph_ref, b_ref, ta_ref, o_ref, *, n_layers):
    # Fused BitParm stack: sph/b stacked (L, Rt, 1), ta stacked (L-1, Rt, 1).
    # Layers 0..L-2 non-final, layer L-1 final (sigmoid).  Tile stays
    # resident on-chip across all layers (single HBM round-trip).
    y = x_ref[...].astype(jnp.float32)
    for l in range(n_layers):
        y = y * sph_ref[l] + b_ref[l]
        if l < n_layers - 1:
            y = y + jnp.tanh(y) * ta_ref[l]
        else:
            y = jax.nn.sigmoid(y)
    o_ref[...] = y.astype(o_ref.dtype)


# ---------------------------------------------------------------------------
# Wrappers
# ---------------------------------------------------------------------------
@functools.partial(jax.jit, static_argnames=("final",))
def bitparm_forward(x, h, b, a=None, *, final=False):
    """Single BitParm layer.  x: (N, C, H, W); h, b, a: (1, C, 1, 1)."""
    N, C, H, W = x.shape
    R, HW = N * C, H * W
    itemsize = jnp.dtype(x.dtype).itemsize

    budget = _hw_budget()
    r_t, hw_t = _choose_tiles(R, HW, itemsize, budget)
    # Lane axis (j) is the innermost grid dim: param blocks (index_map only
    # depends on i) are not re-DMA'd across the inner loop.
    grid = (pl.cdiv(R, r_t), pl.cdiv(HW, hw_t))

    xf = x.reshape(R, HW)
    sph_r = _param_rows(jax.nn.softplus(h.astype(jnp.float32)), N, C)  # hoisted
    b_r = _param_rows(b, N, C)

    x_spec = pl.BlockSpec((r_t, hw_t), lambda i, j: (i, j))
    p_spec = pl.BlockSpec((r_t, 1), lambda i, j: (i, 0))

    if final:
        kernel = _bitparm_kernel_final
        in_specs = [x_spec, p_spec, p_spec]
        args = (xf, sph_r, b_r)
        flops, n_params = 2 * R * HW, 2
    else:
        assert a is not None
        ta_r = _param_rows(jnp.tanh(a.astype(jnp.float32)), N, C)      # hoisted
        kernel = _bitparm_kernel_nonfinal
        in_specs = [x_spec, p_spec, p_spec, p_spec]
        args = (xf, sph_r, b_r, ta_r)
        flops, n_params = 4 * R * HW, 3

    out = pl.pallas_call(
        kernel,
        out_shape=jax.ShapeDtypeStruct((R, HW), x.dtype),
        grid_spec=pltpu.PrefetchScalarGridSpec(
            num_scalar_prefetch=0,
            grid=grid,
            in_specs=in_specs,
            out_specs=x_spec,
        ),
        compiler_params=pltpu.CompilerParams(
            dimension_semantics=("parallel", "parallel"),
            vmem_limit_bytes=budget["vmem_limit"],
        ),
        cost_estimate=pl.CostEstimate(
            flops=flops,
            transcendentals=R * HW,   # only tanh(y) / sigmoid(y) left in-kernel
            bytes_accessed=2 * R * HW * itemsize + n_params * R * 4,
        ),
    )(*args)
    return out.reshape(N, C, H, W)


@jax.jit
def bitparm_chain_forward(x, hs, bs, a_s):
    """Fused stack of BitParm layers (entropy-model f1..fL): layers 0..L-2
    are non-final, layer L-1 is final.  hs/bs: L params, a_s: L-1 params,
    each of shape (1, C, 1, 1).  One HBM round-trip for the whole chain.
    Requires L >= 2 (a single final layer goes through bitparm_forward)."""
    N, C, H, W = x.shape
    L = len(hs)
    assert L >= 2 and len(bs) == L and len(a_s) == L - 1
    R, HW = N * C, H * W
    itemsize = jnp.dtype(x.dtype).itemsize

    budget = _hw_budget()
    r_t, hw_t = _choose_tiles(R, HW, itemsize, budget)
    grid = (pl.cdiv(R, r_t), pl.cdiv(HW, hw_t))

    xf = x.reshape(R, HW)
    sph_st = jnp.stack([_param_rows(jax.nn.softplus(p.astype(jnp.float32)), N, C)
                        for p in hs])                                  # (L,   R, 1)
    b_st = jnp.stack([_param_rows(p, N, C) for p in bs])               # (L,   R, 1)
    ta_st = jnp.stack([_param_rows(jnp.tanh(p.astype(jnp.float32)), N, C)
                       for p in a_s])                                  # (L-1, R, 1)

    x_spec = pl.BlockSpec((r_t, hw_t), lambda i, j: (i, j))

    def p_spec(n):
        return pl.BlockSpec((n, r_t, 1), lambda i, j: (0, i, 0))

    out = pl.pallas_call(
        functools.partial(_bitparm_chain_kernel, n_layers=L),
        out_shape=jax.ShapeDtypeStruct((R, HW), x.dtype),
        grid_spec=pltpu.PrefetchScalarGridSpec(
            num_scalar_prefetch=0,
            grid=grid,
            in_specs=[x_spec, p_spec(L), p_spec(L), p_spec(L - 1)],
            out_specs=x_spec,
        ),
        compiler_params=pltpu.CompilerParams(
            dimension_semantics=("parallel", "parallel"),
            vmem_limit_bytes=budget["vmem_limit"],
        ),
        cost_estimate=pl.CostEstimate(
            flops=(4 * (L - 1) + 2) * R * HW,
            transcendentals=L * R * HW,             # (L-1) tanh + 1 sigmoid
            bytes_accessed=2 * R * HW * itemsize + (3 * L - 1) * R * 4,
        ),
    )(xf, sph_st, b_st, ta_st)
    return out.reshape(N, C, H, W)


# ---------------------------------------------------------------------------
# Pure-JAX references
# ---------------------------------------------------------------------------
def _ref_bitparm(x, h, b, a=None, *, final=False):
    y = x * jax.nn.softplus(h) + b
    if final:
        return jax.nn.sigmoid(y)
    return y + jnp.tanh(y) * jnp.tanh(a)


def _ref_chain(x, hs, bs, a_s):
    y = x
    L = len(hs)
    for l in range(L):
        y = _ref_bitparm(y, hs[l], bs[l], a_s[l] if l < L - 1 else None,
                         final=(l == L - 1))
    return y


if __name__ == "__main__":
    key = jax.random.PRNGKey(0)
    N, C, H, W = 2, 4, 16, 16
    L = 4
    keys = jax.random.split(key, 1 + 3 * L)

    x = jax.random.normal(keys[0], (N, C, H, W), dtype=jnp.float32)
    # nn.init.normal_(..., 0, 0.01) on shape (1, C, 1, 1)
    hs = tuple(0.01 * jax.random.normal(keys[1 + i], (1, C, 1, 1), jnp.float32)
               for i in range(L))
    bs = tuple(0.01 * jax.random.normal(keys[1 + L + i], (1, C, 1, 1), jnp.float32)
               for i in range(L))
    a_s = tuple(0.01 * jax.random.normal(keys[1 + 2 * L + i], (1, C, 1, 1), jnp.float32)
                for i in range(L - 1))
    h, b, a = hs[0], bs[0], a_s[0]

    # --- single non-final BitParm ---
    out = bitparm_forward(x, h, b, a, final=False)
    jax.block_until_ready(out)
    ref = _ref_bitparm(x, h, b, a, final=False)
    assert out.shape == (N, C, H, W)
    assert jnp.allclose(out, ref, atol=1e-5, rtol=1e-5)

    # --- single final BitParm ---
    out_f = bitparm_forward(x, h, b, final=True)
    jax.block_until_ready(out_f)
    ref_f = _ref_bitparm(x, h, b, final=True)
    assert jnp.allclose(out_f, ref_f, atol=1e-5, rtol=1e-5)

    # --- bf16 HBM I/O (f32 math stays in-kernel) ---
    xb = x.astype(jnp.bfloat16)
    out_b = bitparm_forward(xb, h, b, a, final=False)
    jax.block_until_ready(out_b)
    ref_b = _ref_bitparm(xb.astype(jnp.float32), h, b, a, final=False)
    assert out_b.dtype == jnp.bfloat16
    assert jnp.allclose(out_b.astype(jnp.float32), ref_b, atol=2e-2, rtol=2e-2)

    # --- fused 4-layer chain (entropy model f1..f4) ---
    out_c = bitparm_chain_forward(x, hs, bs, a_s)
    jax.block_until_ready(out_c)
    ref_c = _ref_chain(x, hs, bs, a_s)
    assert jnp.allclose(out_c, ref_c, atol=1e-5, rtol=1e-5)

    print("KERNEL_OK")
</pallas_src>

<mosaic_0001>
module attributes {stable_mosaic.version = 11 : i64} {
  func.func @_bitparm_kernel_nonfinal(%arg0: i32, %arg1: i32, %arg2: memref<8x256xf32, #tpu.memory_space<vmem>>, %arg3: memref<8x1xf32, #tpu.memory_space<vmem>>, %arg4: memref<8x1xf32, #tpu.memory_space<vmem>>, %arg5: memref<8x1xf32, #tpu.memory_space<vmem>>, %arg6: memref<8x256xf32, #tpu.memory_space<vmem>>) attributes {dimension_semantics = [#tpu.dimension_semantics<parallel>, #tpu.dimension_semantics<parallel>], iteration_bounds = array<i64: 1, 1>, scalar_prefetch = 0 : i64, scratch_operands = 0 : i64, tpu.core_type = #tpu.core_type<tc>, window_params = [{transform_indices = @transform_0, window_bounds = array<i64: 8, 256>}, {transform_indices = @transform_1, window_bounds = array<i64: 8, 1>}, {transform_indices = @transform_2, window_bounds = array<i64: 8, 1>}, {transform_indices = @transform_3, window_bounds = array<i64: 8, 1>}, {transform_indices = @transform_4, window_bounds = array<i64: 8, 256>}]} {
    %c0 = arith.constant 0 : index
    %c0_0 = arith.constant 0 : index
    %0 = vector.load %arg2[%c0, %c0_0] : memref<8x256xf32, #tpu.memory_space<vmem>>, vector<8x256xf32>
    %c0_1 = arith.constant 0 : index
    %c0_2 = arith.constant 0 : index
    %1 = vector.load %arg3[%c0_1, %c0_2] : memref<8x1xf32, #tpu.memory_space<vmem>>, vector<8x1xf32>
    %2 = vector.broadcast %1 : vector<8x1xf32> to vector<8x256xf32>
    %3 = arith.mulf %0, %2 : vector<8x256xf32>
    %c0_3 = arith.constant 0 : index
    %c0_4 = arith.constant 0 : index
    %4 = vector.load %arg4[%c0_3, %c0_4] : memref<8x1xf32, #tpu.memory_space<vmem>>, vector<8x1xf32>
    %5 = vector.broadcast %4 : vector<8x1xf32> to vector<8x256xf32>
    %6 = arith.addf %3, %5 : vector<8x256xf32>
    %7 = math.tanh %6 : vector<8x256xf32>
    %c0_5 = arith.constant 0 : index
    %c0_6 = arith.constant 0 : index
    %8 = vector.load %arg5[%c0_5, %c0_6] : memref<8x1xf32, #tpu.memory_space<vmem>>, vector<8x1xf32>
    %9 = vector.broadcast %8 : vector<8x1xf32> to vector<8x256xf32>
    %10 = arith.mulf %7, %9 : vector<8x256xf32>
    %11 = arith.addf %6, %10 : vector<8x256xf32>
    %c0_7 = arith.constant 0 : index
    %c0_8 = arith.constant 0 : index
    %12 = vector.load %arg6[%c0_7, %c0_8] : memref<8x256xf32, #tpu.memory_space<vmem>>, vector<8x256xf32>
    tpu.vector_store %arg6[%c0_7, %c0_8], %11 {strides = array<i32>} : memref<8x256xf32, #tpu.memory_space<vmem>>, vector<8x256xf32>,
    return
  }
  func.func @transform_0(%arg0: i32, %arg1: i32) -> (i32, i32) {
    %c0_i32 = arith.constant 0 : i32
    return %arg0, %arg1 : i32, i32
  }
  func.func @transform_1(%arg0: i32, %arg1: i32) -> (i32, i32) {
    %c0_i32 = arith.constant 0 : i32
    %c0_i32_0 = arith.constant 0 : i32
    return %arg0, %c0_i32 : i32, i32
  }
  func.func @transform_2(%arg0: i32, %arg1: i32) -> (i32, i32) {
    %c0_i32 = arith.constant 0 : i32
    %c0_i32_0 = arith.constant 0 : i32
    return %arg0, %c0_i32 : i32, i32
  }
  func.func @transform_3(%arg0: i32, %arg1: i32) -> (i32, i32) {
    %c0_i32 = arith.constant 0 : i32
    %c0_i32_0 = arith.constant 0 : i32
    return %arg0, %c0_i32 : i32, i32
  }
  func.func @transform_4(%arg0: i32, %arg1: i32) -> (i32, i32) {
    %c0_i32 = arith.constant 0 : i32
    return %arg0, %arg1 : i32, i32
  }
}

</mosaic_0001>

<bundles_post_ra>
// kernel: bitparm_forward.1
= control target key start
LH: loop header
LB: loop body
LE: loop exit
PB: predicated region body
PF: predicated region fallthrough
CT: control target
= control target key end

     0   :  { %9 = vsyncpa [#allocation3], 0  ;;  %s335_s0 = inlined_call_operand.hbm [shape: f32[8,256], index: 0, kind: input, shape index: {}]   ;;  %s336_s1 = inlined_call_operand.hbm [shape: f32[8,1], index: 1, kind: input, shape index: {}]   ;;  %s337_s2 = inlined_call_operand.hbm [shape: f32[8,1], index: 2, kind: input, shape index: {}]   ;;  %s338_s3 = inlined_call_operand.hbm [shape: f32[8,1], index: 3, kind: input, shape index: {}]   ;;  %s339_s4 = inlined_call_operand.hbm [shape: f32[8,256], index: 4, kind: output, shape index: {}]  }
   0x1   :  { %10 = vsyncpa [#allocation6], 0 }
   0x2   :  { %11 = vsyncpa [#allocation9], 0 }
   0x3   :  { %12 = vsyncpa [#allocation4], 0  ;;  %s244_s15 = smov [#allocation5]   ;;  %s245_s17 = smov [#allocation2]  }
   0x4   :  { %s29_s16 = sshll.u32 %s244_s15, 4  ;;  %s19_s18 = sshll.u32 %s245_s17, 4  ;;  %s30_s16 = int_to_ptr.vmem [resolvable:$true] %s29_s16  ;;  %s20_s18 = int_to_ptr.vmem [resolvable:$true] %s19_s18 }
   0x5   :  { %s126_s21 = scalar_lea.hbm %s336_s1, 128 }
   0x6   :  { %p127_p0 = scmp.ne.s32.totalorder %s336_s1, %s126_s21  ;;  %p130_p1 = scmp.lt.u32.totalorder %s126_s21, %s336_s1 }
   0x8   :  { %p132_p2 = pnand %p130_p1, %p127_p0 }
   0xa   :  { %135 = shalt.err (!%p132_p2)
}
   0xb   :  { %s136_s26 = scalar_lea.vmem %s30_s16, 128  ;;  %p141_p4 = scmp.lt.s32.totalorder %s30_s16, %s30_s16 }
   0xc   :  { %p137_p3 = scmp.ne.s32.totalorder %s30_s16, %s136_s26  ;;  %p142_p5 = scmp.lt.s32.totalorder %s136_s26, %s136_s26 }
   0xe   :  { %p143_p6 = por %p142_p5, %p141_p4 }
  0x10   :  { %p144_p7 = pnand %p143_p6, %p137_p3 }
  0x12   :  { %147 = shalt.err (!%p144_p7)
}
  0x13   :  { %32 = dma.hbm_to_vmem [thread:$0]  %s336_s1, 128, %s30_s16, [#allocation6]  }
  0x14   :  { %s148_s5 = scalar_lea.hbm %s335_s0, 256 }
  0x15   :  { %p149_p8 = scmp.ne.s32.totalorder %s335_s0, %s148_s5  ;;  %p152_p9 = scmp.lt.u32.totalorder %s148_s5, %s335_s0 }
  0x17   :  { %p154_p10 = pnand %p152_p9, %p149_p8 }
  0x19   :  { %157 = shalt.err (!%p154_p10)
}
  0x1a   :  { %s158_s10 = scalar_lea.vmem %s20_s18, 256  ;;  %p163_p12 = scmp.lt.s32.totalorder %s20_s18, %s20_s18 }
  0x1b   :  { %p159_p11 = scmp.ne.s32.totalorder %s20_s18, %s158_s10  ;;  %p164_p13 = scmp.lt.s32.totalorder %s158_s10, %s158_s10 }
  0x1d   :  { %p165_p0 = por %p164_p13, %p163_p12 }
  0x1f   :  { %p166_p1 = pnand %p165_p0, %p159_p11 }
  0x21   :  { %169 = shalt.err (!%p166_p1)
}
  0x22   :  { %22 = dma.hbm_to_vmem [thread:$0]  %s335_s0, 256, %s20_s18, [#allocation3]  }
  0x23   :  { %s246_s12 = smov [#allocation7]   ;;  %s247_s14 = smov [#allocation8]  }
  0x24   :  { %s39_s13 = sshll.u32 %s246_s12, 4  ;;  %s49_s15 = sshll.u32 %s247_s14, 4  ;;  %s40_s13 = int_to_ptr.vmem [resolvable:$true] %s39_s13  ;;  %s50_s15 = int_to_ptr.vmem [resolvable:$true] %s49_s15 }
  0x25   :  { %s170_s19 = scalar_lea.hbm %s337_s2, 128 }
  0x26   :  { %p171_p2 = scmp.ne.s32.totalorder %s337_s2, %s170_s19  ;;  %p174_p3 = scmp.lt.u32.totalorder %s170_s19, %s337_s2 }
  0x28   :  { %p176_p4 = pnand %p174_p3, %p171_p2 }
  0x2a   :  { %179 = shalt.err (!%p176_p4)
}
  0x2b   :  { %s180_s0 = scalar_lea.vmem %s40_s13, 128  ;;  %p185_p6 = scmp.lt.s32.totalorder %s40_s13, %s40_s13 }
  0x2c   :  { %p181_p5 = scmp.ne.s32.totalorder %s40_s13, %s180_s0  ;;  %p186_p7 = scmp.lt.s32.totalorder %s180_s0, %s180_s0 }
  0x2e   :  { %p187_p8 = por %p186_p7, %p185_p6 }
  0x30   :  { %p188_p9 = pnand %p187_p8, %p181_p5 }
  0x32   :  { %191 = shalt.err (!%p188_p9)
}
  0x33   :  { %42 = dma.hbm_to_vmem [thread:$0]  %s337_s2, 128, %s40_s13, [#allocation6]  }
  0x34   :  { %s192_s27 = scalar_lea.hbm %s338_s3, 128 }
  0x35   :  { %p193_p10 = scmp.ne.s32.totalorder %s338_s3, %s192_s27  ;;  %p196_p11 = scmp.lt.u32.totalorder %s192_s27, %s338_s3 }
  0x37   :  { %p198_p12 = pnand %p196_p11, %p193_p10 }
  0x39   :  { %201 = shalt.err (!%p198_p12)
}
  0x3a   :  { %s202_s6 = scalar_lea.vmem %s50_s15, 128  ;;  %p207_p0 = scmp.lt.s32.totalorder %s50_s15, %s50_s15 }
  0x3b   :  { %p203_p13 = scmp.ne.s32.totalorder %s50_s15, %s202_s6  ;;  %p208_p1 = scmp.lt.s32.totalorder %s202_s6, %s202_s6 }
  0x3d   :  { %p209_p2 = por %p208_p1, %p207_p0 }
  0x3f   :  { %p210_p3 = pnand %p209_p2, %p203_p13 }
  0x41   :  { %213 = shalt.err (!%p210_p3)
}
  0x42   :  { %52 = dma.hbm_to_vmem [thread:$0]  %s338_s3, 128, %s50_s15, [#allocation9]  }
  0x43   :  { %236 = dma.done.wait [#allocation3], 256  }
  0x44   :  { %237 = vsyncadd [#allocation3], 4294967040 }
  0x45   :  { %238 = dma.done.wait [#allocation6], 256  }
  0x46   :  { %239 = vsyncadd [#allocation6], 4294967040 }
  0x47   :  { %240 = dma.done.wait [#allocation9], 128  }
  0x48   :  { %241 = vsyncadd [#allocation9], 4294967168  ;;  %v248_v0 = vmov 0   ;;  %v67_v1 = vld [vmem:[#allocation5] sm:$0xff]  ;;  %v85_v2 = vld [vmem:[#allocation8] sm:$0xff]  ;;  %s249_s3 = smov [#allocation10]  }
  0x49   :  { %120 = vset.pattern.permute.xlu0 %v248_v0  ;;  %121 = vset.pattern.permute.xlu1 %v248_v0  ;;  %v75_v3 = vld [vmem:[#allocation7] sm:$0xff]  ;;  %v65_v5 = vld [vmem:[#allocation2] sm:$0xff]  ;;  %v66_v6 = vld [vmem:[#allocation2 + $0x8] sm:$0xff]  ;;  %s103_s8 = sshll.u32 %s249_s3, 4  ;;  %s104_s8 = int_to_ptr.vmem [resolvable:$true] %s103_s8 }
  0x4a   :  { %70 = vperm.xlu0 %120, %v67_v1   ;;  %88 = vperm.xlu1 %121, %v85_v2   ;;  %s214_s9 = scalar_lea.vmem %s104_s8, 256  ;;  %p219_p5 = scmp.lt.s32.totalorder %s104_s8, %s104_s8 }
  0x4b   :  { %p215_p4 = scmp.ne.s32.totalorder %s104_s8, %s214_s9  ;;  %p220_p6 = scmp.lt.s32.totalorder %s214_s9, %s214_s9 }
  0x4d   :  { %p221_p7 = por %p220_p6, %p219_p5 }
  0x4e   :  { %78 = vperm.xlu0 %120, %v75_v3  }
  0x4f   :  { %p222_p8 = pnand %p221_p7, %p215_p4 }
  0xc9   :  { %v71_v4 = vpop.permute.xlu0 %70  ;;  %v89_v12 = vpop.permute.xlu1 %88 }
  0xca   :  { %v73_v7 = vmul.f32 %v71_v4, %v65_v5  ;;  %v74_v8 = vmul.f32 %v71_v4, %v66_v6 }
  0xcd   :  { %v79_v9 = vpop.permute.xlu0 %78 }
  0xce   :  { %v81_v10 = vadd.f32 %v79_v9, %v73_v7  ;;  %v82_v11 = vadd.f32 %v79_v9, %v74_v8 }
  0xd0   :  { %122 = vtanh.f32 %v81_v10 }
  0xd1   :  { %124 = vtanh.f32 %v82_v11 }
  0xda   :  { %v123_v13 = vpop.eup %122 }
  0xdb   :  { %v125_v14 = vpop.eup %124  ;;  %v91_v15 = vmul.f32 %v123_v13, %v89_v12 }
  0xdc   :  { %v92_v16 = vmul.f32 %v125_v14, %v89_v12 }
  0xdd   :  { %v93_v17 = vadd.f32 %v91_v15, %v81_v10 }
  0xde   :  { %v94_v18 = vadd.f32 %v92_v16, %v82_v11 }
  0xdf   :  { %95 = vst [vmem:[#allocation10] sm:$0xff] %v93_v17 }
  0xe0   :  { %96 = vst [vmem:[#allocation10 + $0x8] sm:$0xff] %v94_v18 }
  0xe1   :  { %225 = shalt.err (!%p222_p8)
}
  0xe2   :  { %s226_s11 = scalar_lea.hbm %s339_s4, 256 }
  0xe3   :  { %p227_p9 = scmp.ne.s32.totalorder %s339_s4, %s226_s11  ;;  %p230_p10 = scmp.lt.u32.totalorder %s226_s11, %s339_s4 }
  0xe5   :  { %p232_p11 = pnand %p230_p10, %p227_p9 }
  0xe7   :  { %235 = shalt.err (!%p232_p11)
}
  0xe8   :  { %106 = dma.vmem_to_hbm [thread:$0]  %s104_s8, 256, %s339_s4, [#allocation4]  }
  0xe9   :  { %242 = dma.done.wait [#allocation4], 256  }
  0xea   :  { %243 = vsyncadd [#allocation4], 4294967040 }
  0xeb   :  { %110 = vsyncpa [#allocation3], 1 }
  0xec   :  { %111 = vsyncpa [#allocation6], 1 }
  0xed   :  { %112 = vsyncpa [#allocation9], 1 }
  0xee   :  { %113 = vsyncpa [#allocation4], 1 }

</bundles_post_ra>
